<compile_context>
chip_gen: v5e
topology: v5e:2x2
jax: 0.10.0
libtpu: 0.0.40
codegen_flags: <defaults>
</compile_context>

<pallas_src>
import functools

import jax
import jax.numpy as jnp
from jax.experimental import pallas as pl
from jax.experimental.pallas import tpu as pltpu

_LANE = 128
_SUBLANE = 8
# Per-buffer cap for keeping the whole (D_in, D_out_p) weight resident in VMEM
# (double-buffered by the pipeline => ~2x this in VMEM, safe on v5e/v6e/v7x).
_DEFAULT_RESIDENT_WEIGHT_BYTES = 8 * 1024 * 1024
_DEFAULT_K_TILE = 512


def _round_up(n, m):
    return ((n + m - 1) // m) * m


def _linear_kernel(x_ref, w_ref, b_ref, o_ref, acc_ref):
    # x_ref: (TB, TK)   w_ref: (TK, D_out_p)   b_ref: (1, D_out_p)
    # o_ref: (TB, D_out_p)   acc_ref: (TB, D_out_p) f32 scratch
    k = pl.program_id(1)

    @pl.when(k == 0)
    def _init():
        acc_ref[...] = jnp.zeros_like(acc_ref)

    acc_ref[...] += jnp.dot(x_ref[...], w_ref[...],
                            preferred_element_type=jnp.float32)

    @pl.when(k == pl.num_programs(1) - 1)
    def _finalize():
        o_ref[...] = (acc_ref[...] + b_ref[...].astype(jnp.float32)
                      ).astype(o_ref.dtype)


def prepare_params(weight, bias, *, param_dtype=jnp.float32,
                   resident_weight_bytes=_DEFAULT_RESIDENT_WEIGHT_BYTES,
                   k_tile=_DEFAULT_K_TILE):
    """One-time parameter prep (hoisted out of the per-call path).

    weight: (D_out, D_in) nn.Linear layout -> returned transposed to
            (K_p, D_out_p) with D_out padded to a lane-dense multiple of 128
            (and D_in padded to the K tile only if the K-tiled path is used).
    bias:   (D_out,) -> (1, D_out_p), kept in float32.
    """
    D_out, D_in = weight.shape
    D_out_p = _round_up(D_out, _LANE)
    itemsize = jnp.dtype(param_dtype).itemsize
    if D_in * D_out_p * itemsize <= resident_weight_bytes:
        K_p = D_in                      # resident-weight path: K stays unpadded
    else:
        K_p = _round_up(D_in, k_tile)   # K-tiled path: pad K to the tile
    w_t = jnp.zeros((K_p, D_out_p), param_dtype)
    w_t = w_t.at[:D_in, :D_out].set(weight.T.astype(param_dtype))
    b_p = jnp.zeros((1, D_out_p), jnp.float32)
    b_p = b_p.at[0, :D_out].set(bias.astype(jnp.float32))
    return w_t, b_p


@functools.partial(
    jax.jit,
    static_argnames=("d_out", "max_batch_tile", "resident_weight_bytes",
                     "k_tile"))
def softmax_model_forward(x, w_t, b_p, d_out, *, max_batch_tile=512,
                          resident_weight_bytes=_DEFAULT_RESIDENT_WEIGHT_BYTES,
                          k_tile=_DEFAULT_K_TILE):
    """Forward pass of SoftmaxModel: flatten to (B, D_in), then Linear.

    x:   (B, ...) whose trailing dims flatten to D_in.
    w_t: (K_p, D_out_p) prepared weight from prepare_params().
    b_p: (1, D_out_p)   prepared bias.
    returns (B, d_out) float32.
    """
    B = x.shape[0]
    D_in = 1
    for s in x.shape[1:]:
        D_in *= s
    K_p, D_out_p = w_t.shape
    in_item = jnp.dtype(w_t.dtype).itemsize

    # --- K tiling (reduction axis, last in grid, "arbitrary") ---------------
    if K_p * D_out_p * in_item <= resident_weight_bytes:
        TK = K_p                 # whole weight resident; grid_k == 1
    else:
        TK = k_tile
    assert K_p % TK == 0, "prepared weight K dim must be a multiple of k_tile"
    grid_k = K_p // TK

    # --- batch tiling ("parallel"; >=2 tiles when B>=16 for v7x's 2 TCs) ----
    B_p = _round_up(B, _SUBLANE)
    if B_p >= 2 * _SUBLANE:
        tb_cap = min(max_batch_tile, _round_up(pl.cdiv(B_p, 2), _SUBLANE))
    else:
        tb_cap = B_p
    n_b = pl.cdiv(B_p, tb_cap)
    TB = _round_up(pl.cdiv(B_p, n_b), _SUBLANE)   # balanced -> minimal padding
    grid_b = pl.cdiv(B_p, TB)
    B_pad = grid_b * TB

    # --- flatten (row-major, same as np.reshape in the torch module) --------
    x_flat = jnp.reshape(x, (B, D_in)).astype(w_t.dtype)
    pad_b = B_pad - B
    pad_k = K_p - D_in
    if pad_b or pad_k:
        # Single pad op inside the jit (fusable); no zeros+scatter copy, and
        # usually a no-op (resident path keeps D_in unpadded).
        x_flat = jnp.pad(x_flat, ((0, pad_b), (0, pad_k)))

    # --- VMEM sizing / cost hint --------------------------------------------
    vmem_needed = (2 * TB * TK * in_item            # x (double-buffered)
                   + 2 * TK * D_out_p * in_item     # weight block
                   + 2 * _SUBLANE * D_out_p * 4     # bias (sublane-padded)
                   + 2 * TB * D_out_p * 4           # output block
                   + TB * D_out_p * 4)              # f32 accumulator scratch
    vmem_limit = int(min(128 * 1024 * 1024,
                         max(32 * 1024 * 1024, 2 * vmem_needed)))

    cost = pl.CostEstimate(
        flops=2 * B_pad * K_p * D_out_p,
        bytes_accessed=(B_pad * K_p * in_item + K_p * D_out_p * in_item
                        + D_out_p * 4 + B_pad * D_out_p * 4),
        transcendentals=0)

    out_padded = pl.pallas_call(
        _linear_kernel,
        out_shape=jax.ShapeDtypeStruct((B_pad, D_out_p), jnp.float32),
        grid=(grid_b, grid_k),
        in_specs=[
            # x: tiled over batch and K.
            pl.BlockSpec((TB, TK), lambda i, k: (i, k)),
            # weight: constant over the batch axis -> stays resident in VMEM
            # when grid_k == 1 (Pallas skips the redundant re-fetch).
            pl.BlockSpec((TK, D_out_p), lambda i, k: (k, 0)),
            # bias: constant block.
            pl.BlockSpec((1, D_out_p), lambda i, k: (0, 0)),
        ],
        out_specs=pl.BlockSpec((TB, D_out_p), lambda i, k: (i, 0)),
        scratch_shapes=[pltpu.VMEM((TB, D_out_p), jnp.float32)],
        compiler_params=pltpu.CompilerParams(
            dimension_semantics=("parallel", "arbitrary"),
            vmem_limit_bytes=vmem_limit),
        cost_estimate=cost,
    )(x_flat, w_t, b_p)

    # Strip padding back to the module's output shape.
    return out_padded[:B, :d_out]


if __name__ == "__main__":
    key = jax.random.PRNGKey(0)

    def init_linear(k, d_in, d_out):
        kw, kb = jax.random.split(k)
        bound = 1.0 / (d_in ** 0.5)
        w = jax.random.uniform(kw, (d_out, d_in), jnp.float32, -bound, bound)
        b = jax.random.uniform(kb, (d_out,), jnp.float32, -bound, bound)
        return w, b

    # --- Test 1: small MNIST-like images, resident weight, single tile ------
    B, C, H, W = 8, 1, 8, 8
    D_in, D_out = C * H * W, 10
    k1, k2, key = jax.random.split(key, 3)
    weight, bias = init_linear(k1, D_in, D_out)
    x = jax.random.normal(k2, (B, C, H, W), jnp.float32)
    w_t, b_p = prepare_params(weight, bias)          # hoisted: once per model
    out = softmax_model_forward(x, w_t, b_p, D_out)
    jax.block_until_ready(out)
    ref = jnp.reshape(x, (B, D_in)) @ weight.T + bias
    assert out.shape == (B, D_out)
    assert jnp.allclose(out, ref, atol=1e-5, rtol=1e-5)

    # --- Test 2: real MNIST flatten (784, not a multiple of 128), 2 tiles ---
    B, D_in, D_out = 32, 784, 10
    k1, k2, key = jax.random.split(key, 3)
    weight, bias = init_linear(k1, D_in, D_out)
    x = jax.random.normal(k2, (B, 1, 28, 28), jnp.float32)
    w_t, b_p = prepare_params(weight, bias)
    out = softmax_model_forward(x, w_t, b_p, D_out)
    jax.block_until_ready(out)
    ref = jnp.reshape(x, (B, D_in)) @ weight.T + bias
    assert out.shape == (B, D_out)
    assert jnp.allclose(out, ref, atol=1e-4, rtol=1e-4)

    # --- Test 3: force the K-tiled accumulator path at a small shape --------
    B, D_in, D_out = 16, 256, 10
    k1, k2, key = jax.random.split(key, 3)
    weight, bias = init_linear(k1, D_in, D_out)
    x = jax.random.normal(k2, (B, D_in), jnp.float32)
    w_t, b_p = prepare_params(weight, bias, resident_weight_bytes=0, k_tile=128)
    out = softmax_model_forward(x, w_t, b_p, D_out,
                                resident_weight_bytes=0, k_tile=128)
    jax.block_until_ready(out)
    ref = x @ weight.T + bias
    assert out.shape == (B, D_out)
    assert jnp.allclose(out, ref, atol=1e-4, rtol=1e-4)

    print("KERNEL_OK")
</pallas_src>

<mosaic_0001>
module attributes {stable_mosaic.version = 11 : i64} {
  func.func @_linear_kernel(%arg0: i32, %arg1: i32, %arg2: memref<8x64xf32, #tpu.memory_space<vmem>>, %arg3: memref<64x128xf32, #tpu.memory_space<vmem>>, %arg4: memref<1x128xf32, #tpu.memory_space<vmem>>, %arg5: memref<8x128xf32, #tpu.memory_space<vmem>>, %arg6: memref<8x128xf32, #tpu.memory_space<vmem>>) attributes {dimension_semantics = [#tpu.dimension_semantics<parallel>, #tpu.dimension_semantics<arbitrary>], iteration_bounds = array<i64: 1, 1>, scalar_prefetch = 0 : i64, scratch_operands = 1 : i64, tpu.core_type = #tpu.core_type<tc>, window_params = [{transform_indices = @transform_0, window_bounds = array<i64: 8, 64>}, {transform_indices = @transform_1, window_bounds = array<i64: 64, 128>}, {pipeline_mode = #tpu.pipeline_mode<synchronous>, transform_indices = @transform_2, window_bounds = array<i64: 1, 128>}, {transform_indices = @transform_3, window_bounds = array<i64: 8, 128>}]} {
    %c0_i32 = arith.constant 0 : i32
    %0 = arith.cmpi eq, %arg1, %c0_i32 : i32
    %1 = arith.extui %0 : i1 to i32
    %c0_i32_0 = arith.constant 0 : i32
    %2 = arith.cmpi ne, %1, %c0_i32_0 : i32
    scf.if %2 {
      %cst_10 = arith.constant 0.000000e+00 : f32
      %12 = vector.broadcast %cst_10 : f32 to vector<8x128xf32>
      %c0_11 = arith.constant 0 : index
      %c0_12 = arith.constant 0 : index
      %13 = vector.load %arg6[%c0_11, %c0_12] : memref<8x128xf32, #tpu.memory_space<vmem>>, vector<8x128xf32>
      tpu.vector_store %arg6[%c0_11, %c0_12], %12 {strides = array<i32>} : memref<8x128xf32, #tpu.memory_space<vmem>>, vector<8x128xf32>,
    } else {
    }
    %c0 = arith.constant 0 : index
    %c0_1 = arith.constant 0 : index
    %3 = vector.load %arg6[%c0, %c0_1] : memref<8x128xf32, #tpu.memory_space<vmem>>, vector<8x128xf32>
    %c0_2 = arith.constant 0 : index
    %c0_3 = arith.constant 0 : index
    %4 = vector.load %arg2[%c0_2, %c0_3] : memref<8x64xf32, #tpu.memory_space<vmem>>, vector<8x64xf32>
    %c0_4 = arith.constant 0 : index
    %c0_5 = arith.constant 0 : index
    %5 = vector.load %arg3[%c0_4, %c0_5] : memref<64x128xf32, #tpu.memory_space<vmem>>, vector<64x128xf32>
    %cst = arith.constant dense<0.000000e+00> : vector<8x128xf32>
    %6 = tpu.matmul %4, %5, %cst {dimension_numbers = #tpu.dot_dimension_numbers<[1], [0], [0], [1], [0, 0, 1, 1], [], []>} : vector<8x64xf32>, vector<64x128xf32>, vector<8x128xf32> -> vector<8x128xf32>
    %7 = arith.addf %3, %6 : vector<8x128xf32>
    %c0_6 = arith.constant 0 : index
    %c0_7 = arith.constant 0 : index
    %8 = vector.load %arg6[%c0_6, %c0_7] : memref<8x128xf32, #tpu.memory_space<vmem>>, vector<8x128xf32>
    tpu.vector_store %arg6[%c0_6, %c0_7], %7 {strides = array<i32>} : memref<8x128xf32, #tpu.memory_space<vmem>>, vector<8x128xf32>,
    %c0_i32_8 = arith.constant 0 : i32
    %9 = arith.cmpi eq, %arg1, %c0_i32_8 : i32
    %10 = arith.extui %9 : i1 to i32
    %c0_i32_9 = arith.constant 0 : i32
    %11 = arith.cmpi ne, %10, %c0_i32_9 : i32
    scf.if %11 {
      %c0_10 = arith.constant 0 : index
      %c0_11 = arith.constant 0 : index
      %12 = vector.load %arg6[%c0_10, %c0_11] : memref<8x128xf32, #tpu.memory_space<vmem>>, vector<8x128xf32>
      %c0_12 = arith.constant 0 : index
      %c0_13 = arith.constant 0 : index
      %13 = vector.load %arg4[%c0_12, %c0_13] : memref<1x128xf32, #tpu.memory_space<vmem>>, vector<1x128xf32>
      %14 = vector.broadcast %13 : vector<1x128xf32> to vector<8x128xf32>
      %15 = arith.addf %12, %14 : vector<8x128xf32>
      %c0_14 = arith.constant 0 : index
      %c0_15 = arith.constant 0 : index
      %16 = vector.load %arg5[%c0_14, %c0_15] : memref<8x128xf32, #tpu.memory_space<vmem>>, vector<8x128xf32>
      tpu.vector_store %arg5[%c0_14, %c0_15], %15 {strides = array<i32>} : memref<8x128xf32, #tpu.memory_space<vmem>>, vector<8x128xf32>,
    } else {
    }
    return
  }
  func.func @transform_0(%arg0: i32, %arg1: i32) -> (i32, i32) {
    %c0_i32 = arith.constant 0 : i32
    return %arg0, %arg1 : i32, i32
  }
  func.func @transform_1(%arg0: i32, %arg1: i32) -> (i32, i32) {
    %c0_i32 = arith.constant 0 : i32
    %c0_i32_0 = arith.constant 0 : i32
    return %arg1, %c0_i32 : i32, i32
  }
  func.func @transform_2(%arg0: i32, %arg1: i32) -> (i32, i32) {
    %c0_i32 = arith.constant 0 : i32
    %c0_i32_0 = arith.constant 0 : i32
    %c0_i32_1 = arith.constant 0 : i32
    return %c0_i32, %c0_i32_0 : i32, i32
  }
  func.func @transform_3(%arg0: i32, %arg1: i32) -> (i32, i32) {
    %c0_i32 = arith.constant 0 : i32
    %c0_i32_0 = arith.constant 0 : i32
    return %arg0, %c0_i32 : i32, i32
  }
}

</mosaic_0001>

<bundles_post_ra>
// kernel: softmax_model_forward.1
= control target key start
LH: loop header
LB: loop body
LE: loop exit
PB: predicated region body
PF: predicated region fallthrough
CT: control target
= control target key end

     0   :  { %s165_s0 = inlined_call_operand.vmem [shape: f32[8,64], index: 0, kind: input, shape index: {}]   ;;  %s166_s1 = inlined_call_operand.vmem [shape: f32[64,128], index: 1, kind: input, shape index: {}]   ;;  %s167_s2 = inlined_call_operand.vmem [shape: f32[1,128], index: 2, kind: input, shape index: {}]   ;;  %s168_s3 = inlined_call_operand.hbm [shape: f32[8,128], index: 3, kind: output, shape index: {}]  }
   0x1   :  { %v29_v0 = vld [vmem:[%s166_s1 + $0x38] sm:$0xff]  ;;  %v28_v1 = vld [vmem:[%s166_s1 + $0x30] sm:$0xff]  ;;  %v27_v2 = vld [vmem:[%s166_s1 + $0x28] sm:$0xff] }
   0x2   :  { %42 = vmatpush.msra.mxu0 %v29_v0 }
   0x4   :  { %43 = vmatpush.msra.mxu0 %v28_v1 }
   0x5   :  { %8 = vsyncpa [#allocation4], 0  ;;  %v26_v3 = vld [vmem:[%s166_s1 + $0x20] sm:$0xff]  ;;  %v25_v4 = vld [vmem:[%s166_s1 + $0x18] sm:$0xff]  ;;  %vm30_vm0 = vcmask 523264   ;;  %s111_s5 = smov [#allocation3]  }
   0x6   :  { %44 = vmatpush.msra.mxu0 %v27_v2  ;;  %v24_v5 = vld [vmem:[%s166_s1 + $0x10] sm:$0xff]  ;;  %v23_v6 = vld [vmem:[%s166_s1 + $0x8] sm:$0xff]  ;;  %v22_v7 = vld [vmem:[%s166_s1] sm:$0xff]  ;;  %s71_s6 = sshll.u32 %s111_s5, 4  ;;  %s73_s9 = sshll.u32 %s168_s3, 4  ;;  %s72_s6 = int_to_ptr.vmem [resolvable:$true] %s71_s6  ;;  %s74_s9 = int_to_ptr.hbm [resolvable:$true] %s73_s9 }
   0x7   :  { %v21_v8 = vld [vmem:[%s165_s0] sm:$0xff] }
   0x8   :  { %45 = vmatpush.msra.mxu0 %v26_v3  ;;  %v84_v9 = vld [vmem:[%s167_s2] ss:$0 sm:$0xff] }
   0xa   :  { %46 = vmatpush.msra.mxu0 %v25_v4 }
   0xc   :  { %47 = vmatpush.msra.mxu0 %v24_v5 }
   0xe   :  { %48 = vmatpush.msra.mxu0 %v23_v6 }
  0x10   :  { %49 = vmatpush.msra.mxu0 %v22_v7 }
  0x11   :  { %82 = vmatmul.msk.f32.vlgmr.msra.gmra.mxu0 %vm30_vm0, %v21_v8 }
  0x8e   :  { %v51_v10 = vpop.f32.mrf.mxu0 }
  0x8f   :  { %v64_v11 = vadd.f32 %v84_v9, %v51_v10 }
  0x91   :  { %65 = vst [vmem:[#allocation3] sm:$0xff] %v64_v11 }
  0x92   :  { %76 = dma.vmem_to_hbm [thread:$0]  %s72_s6, 128, %s74_s9, [#allocation4]  }
  0x93   :  { %109 = dma.done.wait [#allocation4], 128  }
  0x94   :  { %110 = vsyncadd [#allocation4], 4294967168 }
  0x95   :  { %81 = vsyncpa [#allocation4], 1 }

</bundles_post_ra>
